<compile_context>
chip_gen: v7x
topology: tpu7x:2x2x1
jax: 0.10.0
libtpu: 0.0.40
codegen_flags: <defaults>
</compile_context>

<pallas_src>
import jax
import jax.numpy as jnp
from jax.experimental import pallas as pl
from jax.experimental.pallas import tpu as pltpu


LANE = 128


def _lane_tiles(f):
    """Number of 128-wide MXU output/contraction tiles a width f occupies."""
    return pl.cdiv(f, LANE)


def fused_gcn_kernel(*refs):
    """refs = (S, x, W1, b1, W2, b2, ..., Wn, bn, out).

    S, x, W* are bf16 (MXU inputs); b* are f32; out is f32 and lane-dense
    (last-layer W/b are padded to a multiple of 128 output columns by the
    wrapper, so the single output store is an unmasked full-lane store).
    """
    s_ref, x_ref = refs[0], refs[1]
    o_ref = refs[-1]
    wb_refs = refs[2:-1]
    n_layers = len(wb_refs) // 2

    s = s_ref[...]          # (N, N)    bf16
    h = x_ref[...]          # (N, F_in) bf16

    for li in range(n_layers):          # static Python unroll (layers are few)
        w = wb_refs[2 * li][...]        # (F_in, F_out) bf16
        b = wb_refs[2 * li + 1][...]    # (1, F_out)    f32

        # Put the cheaper feature width on the dominant N x N matmul.
        # MXU cost is governed by 128-lane tiles, so compare rounded widths.
        if _lane_tiles(h.shape[-1]) <= _lane_tiles(w.shape[-1]):
            sh = jnp.dot(s, h, preferred_element_type=jnp.float32)
            out = jnp.dot(sh.astype(jnp.bfloat16), w,
                          preferred_element_type=jnp.float32)
        else:
            hw = jnp.dot(h, w, preferred_element_type=jnp.float32)
            out = jnp.dot(s, hw.astype(jnp.bfloat16),
                          preferred_element_type=jnp.float32)

        out = out + b                    # f32 epilogue (no bf16 VPU on v5e)
        if li < n_layers - 1:
            h = jnp.maximum(out, 0.0).astype(jnp.bfloat16)
        else:
            o_ref[...] = out             # single lane-dense f32 store


def gcn_model1_forward(S_norm, x, params):
    """Fused forward: all GCN layers in one pallas_call."""
    N = S_norm.shape[0]
    n_layers = len(params)
    out_dim = params[-1][0].shape[1]
    out_pad = _lane_tiles(out_dim) * LANE  # lane-dense output width

    # bf16 MXU operands (S is the only O(N^2) array -- cast once here).
    flat_inputs = [S_norm.astype(jnp.bfloat16), x.astype(jnp.bfloat16)]
    for li, (W, b) in enumerate(params):
        b2d = b.reshape(1, -1).astype(jnp.float32)
        if li == n_layers - 1:
            # Zero-pad last-layer W / b columns -> unmasked full-lane store.
            f_in, f_out = W.shape
            W = jnp.zeros((f_in, out_pad), W.dtype).at[:, :f_out].set(W)
            b2d = jnp.zeros((1, out_pad), jnp.float32).at[:, :f_out].set(b2d)
        flat_inputs.append(W.astype(jnp.bfloat16))
        flat_inputs.append(b2d)

    vmem_spec = pl.BlockSpec(memory_space=pltpu.MemorySpace.VMEM)
    out = pl.pallas_call(
        fused_gcn_kernel,
        out_shape=jax.ShapeDtypeStruct((N, out_pad), jnp.float32),
        in_specs=[vmem_spec] * len(flat_inputs),
        out_specs=vmem_spec,
    )(*flat_inputs)
    return out[:, :out_dim]


# ----------------------------------------------------------------------------
# Init-time glue (matches GCNModel1.normalize_S and torch kaiming init).
# ----------------------------------------------------------------------------
def normalize_S(S):
    d = S.sum(axis=1)
    d_inv = jnp.sqrt(1.0 / d)
    d_inv = jnp.where(jnp.isinf(d_inv), 0.0, d_inv)
    return d_inv[:, None] * S * d_inv[None, :]


def kaiming_uniform(key, in_dim, out_dim):
    bound = jnp.sqrt(6.0 / in_dim)
    return jax.random.uniform(key, (in_dim, out_dim), jnp.float32,
                              minval=-bound, maxval=bound)


def init_gcn_params(key, in_dim, hid_dim, out_dim, n_layers):
    dims = [in_dim] + [hid_dim] * (n_layers - 1) + [out_dim]
    keys = jax.random.split(key, n_layers)
    params = []
    for li in range(n_layers):
        W = kaiming_uniform(keys[li], dims[li], dims[li + 1])
        b = jnp.zeros((dims[li + 1],), jnp.float32)
        params.append((W, b))
    return params


def gcn_model1_reference(S_norm, x, params):
    # Pure-JAX f32 reference of the module's forward.
    n_layers = len(params)
    h = x
    for li, (W, b) in enumerate(params):
        h = S_norm @ h @ W + b[None, :]
        if li < n_layers - 1:
            h = jnp.maximum(h, 0.0)
    return h


if __name__ == "__main__":
    key = jax.random.PRNGKey(0)
    k_s, k_x, k_p = jax.random.split(key, 3)

    N = 16        # graph nodes
    in_dim = 8
    hid_dim = 32
    out_dim = 4
    n_layers = 3  # K is unused by the forward pass

    S_raw = jax.random.uniform(k_s, (N, N), jnp.float32)
    S_norm = normalize_S(S_raw)

    x = jax.random.normal(k_x, (N, in_dim), jnp.float32)
    params = init_gcn_params(k_p, in_dim, hid_dim, out_dim, n_layers)

    out = gcn_model1_forward(S_norm, x, params)
    out = jax.block_until_ready(out)

    ref = gcn_model1_reference(S_norm, x, params)
    assert out.shape == (N, out_dim)
    # bf16 MXU inputs with f32 accumulation -> loosened tolerance vs f32 ref.
    assert jnp.allclose(out, ref, atol=3e-2, rtol=3e-2)

    print("KERNEL_OK")
</pallas_src>

<mosaic_0001>
module attributes {stable_mosaic.version = 11 : i64} {
  func.func @fused_gcn_kernel(%arg0: memref<16x16xbf16, #tpu.memory_space<vmem>>, %arg1: memref<16x8xbf16, #tpu.memory_space<vmem>>, %arg2: memref<8x32xbf16, #tpu.memory_space<vmem>>, %arg3: memref<1x32xf32, #tpu.memory_space<vmem>>, %arg4: memref<32x32xbf16, #tpu.memory_space<vmem>>, %arg5: memref<1x32xf32, #tpu.memory_space<vmem>>, %arg6: memref<32x128xbf16, #tpu.memory_space<vmem>>, %arg7: memref<1x128xf32, #tpu.memory_space<vmem>>, %arg8: memref<16x128xf32, #tpu.memory_space<vmem>>) attributes {dimension_semantics = [], scalar_prefetch = 0 : i64, scratch_operands = 0 : i64, tpu.core_type = #tpu.core_type<tc>} {
    %c0 = arith.constant 0 : index
    %c0_0 = arith.constant 0 : index
    %0 = vector.load %arg0[%c0, %c0_0] : memref<16x16xbf16, #tpu.memory_space<vmem>>, vector<16x16xbf16>
    %c0_1 = arith.constant 0 : index
    %c0_2 = arith.constant 0 : index
    %1 = vector.load %arg1[%c0_1, %c0_2] : memref<16x8xbf16, #tpu.memory_space<vmem>>, vector<16x8xbf16>
    %c0_3 = arith.constant 0 : index
    %c0_4 = arith.constant 0 : index
    %2 = vector.load %arg2[%c0_3, %c0_4] : memref<8x32xbf16, #tpu.memory_space<vmem>>, vector<8x32xbf16>
    %c0_5 = arith.constant 0 : index
    %c0_6 = arith.constant 0 : index
    %3 = vector.load %arg3[%c0_5, %c0_6] : memref<1x32xf32, #tpu.memory_space<vmem>>, vector<1x32xf32>
    %cst = arith.constant dense<0.000000e+00> : vector<16x8xf32>
    %4 = tpu.matmul %0, %1, %cst {dimension_numbers = #tpu.dot_dimension_numbers<[1], [0], [0], [1], [0, 0, 1, 1], [], []>} : vector<16x16xbf16>, vector<16x8xbf16>, vector<16x8xf32> -> vector<16x8xf32>
    %5 = arith.truncf %4 : vector<16x8xf32> to vector<16x8xbf16>
    %cst_7 = arith.constant dense<0.000000e+00> : vector<16x32xf32>
    %6 = tpu.matmul %5, %2, %cst_7 {dimension_numbers = #tpu.dot_dimension_numbers<[1], [0], [0], [1], [0, 0, 1, 1], [], []>} : vector<16x8xbf16>, vector<8x32xbf16>, vector<16x32xf32> -> vector<16x32xf32>
    %7 = vector.broadcast %3 : vector<1x32xf32> to vector<16x32xf32>
    %8 = arith.addf %6, %7 : vector<16x32xf32>
    %cst_8 = arith.constant 0.000000e+00 : f32
    %9 = vector.broadcast %cst_8 : f32 to vector<16x32xf32>
    %10 = arith.maximumf %8, %9 : vector<16x32xf32>
    %11 = arith.truncf %10 : vector<16x32xf32> to vector<16x32xbf16>
    %c0_9 = arith.constant 0 : index
    %c0_10 = arith.constant 0 : index
    %12 = vector.load %arg4[%c0_9, %c0_10] : memref<32x32xbf16, #tpu.memory_space<vmem>>, vector<32x32xbf16>
    %c0_11 = arith.constant 0 : index
    %c0_12 = arith.constant 0 : index
    %13 = vector.load %arg5[%c0_11, %c0_12] : memref<1x32xf32, #tpu.memory_space<vmem>>, vector<1x32xf32>
    %cst_13 = arith.constant dense<0.000000e+00> : vector<16x32xf32>
    %14 = tpu.matmul %0, %11, %cst_13 {dimension_numbers = #tpu.dot_dimension_numbers<[1], [0], [0], [1], [0, 0, 1, 1], [], []>} : vector<16x16xbf16>, vector<16x32xbf16>, vector<16x32xf32> -> vector<16x32xf32>
    %15 = arith.truncf %14 : vector<16x32xf32> to vector<16x32xbf16>
    %cst_14 = arith.constant dense<0.000000e+00> : vector<16x32xf32>
    %16 = tpu.matmul %15, %12, %cst_14 {dimension_numbers = #tpu.dot_dimension_numbers<[1], [0], [0], [1], [0, 0, 1, 1], [], []>} : vector<16x32xbf16>, vector<32x32xbf16>, vector<16x32xf32> -> vector<16x32xf32>
    %17 = vector.broadcast %13 : vector<1x32xf32> to vector<16x32xf32>
    %18 = arith.addf %16, %17 : vector<16x32xf32>
    %cst_15 = arith.constant 0.000000e+00 : f32
    %19 = vector.broadcast %cst_15 : f32 to vector<16x32xf32>
    %20 = arith.maximumf %18, %19 : vector<16x32xf32>
    %21 = arith.truncf %20 : vector<16x32xf32> to vector<16x32xbf16>
    %c0_16 = arith.constant 0 : index
    %c0_17 = arith.constant 0 : index
    %22 = vector.load %arg6[%c0_16, %c0_17] : memref<32x128xbf16, #tpu.memory_space<vmem>>, vector<32x128xbf16>
    %c0_18 = arith.constant 0 : index
    %c0_19 = arith.constant 0 : index
    %23 = vector.load %arg7[%c0_18, %c0_19] : memref<1x128xf32, #tpu.memory_space<vmem>>, vector<1x128xf32>
    %cst_20 = arith.constant dense<0.000000e+00> : vector<16x32xf32>
    %24 = tpu.matmul %0, %21, %cst_20 {dimension_numbers = #tpu.dot_dimension_numbers<[1], [0], [0], [1], [0, 0, 1, 1], [], []>} : vector<16x16xbf16>, vector<16x32xbf16>, vector<16x32xf32> -> vector<16x32xf32>
    %25 = arith.truncf %24 : vector<16x32xf32> to vector<16x32xbf16>
    %cst_21 = arith.constant dense<0.000000e+00> : vector<16x128xf32>
    %26 = tpu.matmul %25, %22, %cst_21 {dimension_numbers = #tpu.dot_dimension_numbers<[1], [0], [0], [1], [0, 0, 1, 1], [], []>} : vector<16x32xbf16>, vector<32x128xbf16>, vector<16x128xf32> -> vector<16x128xf32>
    %27 = vector.broadcast %23 : vector<1x128xf32> to vector<16x128xf32>
    %28 = arith.addf %26, %27 : vector<16x128xf32>
    %c0_22 = arith.constant 0 : index
    %c0_23 = arith.constant 0 : index
    %29 = vector.load %arg8[%c0_22, %c0_23] : memref<16x128xf32, #tpu.memory_space<vmem>>, vector<16x128xf32>
    tpu.vector_store %arg8[%c0_22, %c0_23], %28 {strides = array<i32>} : memref<16x128xf32, #tpu.memory_space<vmem>>, vector<16x128xf32>,
    return
  }
}

</mosaic_0001>

<bundles_post_ra>
// kernel: tpu_custom_call.1
= control target key start
LH: loop header
LB: loop body
LE: loop exit
PB: predicated region body
PF: predicated region fallthrough
CT: control target
= control target key end

     0   :  { %13 = vsyncpa [#allocation3], 0  ;;  %s701_s0 = inlined_call_operand.hbm [shape: bf16[16,16], index: 0, kind: input, shape index: {}]   ;;  %s702_s1 = inlined_call_operand.vmem [shape: bf16[16,8], index: 1, kind: input, shape index: {}]   ;;  %s703_s2 = inlined_call_operand.hbm [shape: bf16[8,32], index: 2, kind: input, shape index: {}]   ;;  %s704_s3 = inlined_call_operand.vmem [shape: f32[1,32], index: 3, kind: input, shape index: {}]   ;;  %s705_s4 = inlined_call_operand.vmem [shape: bf16[32,32], index: 4, kind: input, shape index: {}]   ;;  %s706_s5 = inlined_call_operand.vmem [shape: f32[1,32], index: 5, kind: input, shape index: {}]   ;;  %s707_s6 = inlined_call_operand.vmem [shape: bf16[32,128], index: 6, kind: input, shape index: {}]   ;;  %s708_s7 = inlined_call_operand.vmem [shape: f32[1,128], index: 7, kind: input, shape index: {}]   ;;  %s709_s8 = inlined_call_operand.hbm [shape: f32[16,128], index: 8, kind: output, shape index: {}]  }
   0x1   :  { %14 = vsyncpa [#allocation6], 0 }
   0x2   :  { %15 = vsyncpa [#allocation4], 0  ;;  %s576_s27 = smov [#allocation2]   ;;  %s504_s9 = scalar_lea.hbm %s701_s0, 128 }
   0x3   :  { %s21_s28 = sshll.u32 %s576_s27, 4  ;;  %p505_p0 = scmp.ne.s32.totalorder %s701_s0, %s504_s9  ;;  %s22_s28 = int_to_ptr.vmem [resolvable:$true] %s21_s28 }
   0x4   :  { %p508_p1 = scmp.lt.u32.totalorder %s504_s9, %s701_s0 }
   0x6   :  { %p510_p2 = pnand %p508_p1, %p505_p0 }
   0x8   :  { %513 = shalt.err (!%p510_p2)
}
   0x9   :  { %s514_s14 = scalar_lea.vmem %s22_s28, 128  ;;  %p519_p4 = scmp.lt.s32.totalorder %s22_s28, %s22_s28 }
   0xa   :  { %p515_p3 = scmp.ne.s32.totalorder %s22_s28, %s514_s14  ;;  %p520_p5 = scmp.lt.s32.totalorder %s514_s14, %s514_s14 }
   0xc   :  { %p521_p6 = por %p520_p5, %p519_p4 }
   0xe   :  { %p522_p7 = pnand %p521_p6, %p515_p3 }
  0x10   :  { %525 = shalt.err (!%p522_p7)
}
  0x11   :  { %s577_s15 = smov 64   ;;  %s578_s16 = smov 4  }
  0x12   :  { %27 = dma.hbm_to_vmem [thread:$0]  %s701_s0, 128, %s22_s28, [#allocation3], %s577_s15, %s577_s15, %s578_s16  }
  0x13   :  { %s579_s19 = smov [#allocation5]   ;;  %s526_s23 = scalar_lea.hbm %s703_s2, 64 }
  0x14   :  { %s36_s20 = sshll.u32 %s579_s19, 4  ;;  %p527_p8 = scmp.ne.s32.totalorder %s703_s2, %s526_s23  ;;  %s37_s20 = int_to_ptr.vmem [resolvable:$true] %s36_s20 }
  0x15   :  { %p530_p9 = scmp.lt.u32.totalorder %s526_s23, %s703_s2 }
  0x17   :  { %p532_p10 = pnand %p530_p9, %p527_p8 }
  0x19   :  { %535 = shalt.err (!%p532_p10)
}
  0x1a   :  { %s536_s29 = scalar_lea.vmem %s37_s20, 64  ;;  %p541_p12 = scmp.lt.s32.totalorder %s37_s20, %s37_s20 }
  0x1b   :  { %p537_p11 = scmp.ne.s32.totalorder %s37_s20, %s536_s29  ;;  %p542_p13 = scmp.lt.s32.totalorder %s536_s29, %s536_s29 }
  0x1d   :  { %p543_p0 = por %p542_p13, %p541_p12 }
  0x1f   :  { %p544_p1 = pnand %p543_p0, %p537_p11 }
  0x21   :  { %547 = shalt.err (!%p544_p1)
}
  0x22   :  { %39 = dma.hbm_to_vmem [thread:$0]  %s703_s2, 64, %s37_s20, [#allocation6]  }
  0x23   :  { %570 = dma.done.wait [#allocation3], 128  }
  0x24   :  { %571 = vsyncadd [#allocation3], 4294967168 }
  0x25   :  { %572 = dma.done.wait [#allocation6], 64  }
  0x26   :  { %573 = vsyncadd [#allocation6], 4294967232  ;;  %v580_v0 = vmov 0.0   ;;  %vm581_vm0 = vmmov 0   ;;  %v498_v1 = vld [vmem:[%s702_s1] sm:$0xff]   ;;  %vm74_vm1 = vcmask 130048  }
  0x27   :  { %449 = vmatprep.subr.bf16.mxu0 %v580_v0  ;;  %451 = vmatprep.mubr.msk.bf16.mxu0 %vm581_vm0, %v580_v0  ;;  %v499_v2 = vld [vmem:[#allocation2] sm:$0xff]   ;;  %v61_v3 = vld [vmem:[#allocation5] sm:$0xf]  ;;  %vm130_vm2 = vcmask 1043456   ;;  %vm126_vm3 = vcmask 64512   ;;  %vm243_vm4 = vcmask 261120  }
  0x28   :  { %455 = vmatprep.subr.bf16.mxu1 %v580_v0  ;;  %457 = vmatprep.mubr.msk.bf16.mxu1 %vm581_vm0, %v580_v0  ;;  %v132_v4 = vsel %vm130_vm2, %v61_v3, 0  ;;  %v500_v10 = vld [vmem:[%s705_s4] sm:$0xff]   ;;  %v501_v21 = vld [vmem:[%s705_s4 + $0x8] sm:$0xff]   ;;  %s582_s19 = smov [#allocation7]  }
  0x29   :  { %450 = vmatpush3.bf16.msra.mxu0 %v498_v1  ;;  %456 = vmatpush3.bf16.msra.mxu1 %v132_v4  ;;  %v423_v11 = vld [vmem:[%s704_s3] ss:$0 sm:$0xff]  ;;  %v503_v38 = vld [vmem:[%s707_s6 + $0x8] sm:$0xff]   ;;  %s407_s20 = sshll.u32 %s582_s19, 4  ;;  %s408_s20 = int_to_ptr.vmem [resolvable:$true] %s407_s20 }
  0x2a   :  { %461 = vmatprep.subr.bf16.mxu0 %v580_v0  ;;  %467 = vmatprep.subr.bf16.mxu1 %v580_v0  ;;  %v502_v27 = vld [vmem:[%s707_s6] sm:$0xff]   ;;  %s548_s6 = scalar_lea.vmem %s408_s20, 256  ;;  %p553_p3 = scmp.lt.s32.totalorder %s408_s20, %s408_s20 }
  0x2b   :  { %v426_v28 = vld [vmem:[%s706_s5] ss:$0 sm:$0xff]  ;;  %p549_p2 = scmp.ne.s32.totalorder %s408_s20, %s548_s6  ;;  %p554_p4 = scmp.lt.s32.totalorder %s548_s6, %s548_s6 }
  0x2c   :  { %452 = vmatmul.mubr.msk.bf16.vlgmr.msra.gmra.mrb[0].mxu0 %vm74_vm1, %v499_v2  ;;  %v431_v44 = vld [vmem:[%s708_s7] ss:$0 sm:$0xff] }
  0x2d   :  { %463 = vmatprep.mubr.msk.bf16.mxu0 %vm581_vm0, %v580_v0  ;;  %p555_p5 = por %p554_p4, %p553_p3 }
  0x2f   :  { %p556_p6 = pnand %p555_p5, %p549_p2 }
  0xff   :  { %v112_v5 = vpop.f32.mrb[0].mxu0 }
 0x100   :  { %v453_v6 = vpop.f32.mrb[1].mxu0 }
 0x101   :  { %v115_v7 = vpop.f32.mrb[2].mxu0 }
 0x102   :  { %v119_v8 = vpack.c.bf16 %v115_v7, %v112_v5  ;;  %v454_v9 = vpop.f32.mrb[3].mxu0 }
 0x104   :  { %458 = vmatmul.mubr.msk.bf16.vlgmr.msra.gmra.mrb[0].mxu1 %vm126_vm3, %v119_v8 }
 0x105   :  { %471 = vmatprep.mubr.msk.bf16.mxu1 %vm581_vm0, %v580_v0  ;;  %468 = vmatpush3.bf16.msra.mxu1 %v500_v10 }
 0x106   :  { %469 = vmatprep.subr.bf16.mxu1 %v580_v0 }
 0x109   :  { %470 = vmatpush3.bf16.msra.mxu1 %v501_v21 }
 0x10a   :  { %481 = vmatprep.subr.bf16.mxu1 %v580_v0 }
 0x1d7   :  { %v168_v12 = vpop.f32.mrb[0].mxu1 }
 0x1d8   :  { %v169_v13 = vadd.f32 %v423_v11, %v168_v12  ;;  %v459_v14 = vpop.f32.mrb[1].mxu1 }
 0x1d9   :  { %v171_v15 = vpop.f32.mrb[2].mxu1 }
 0x1da   :  { %v172_v16 = vadd.f32 %v423_v11, %v171_v15  ;;  %v460_v17 = vpop.f32.mrb[3].mxu1  ;;  %v175_v18 = vmax.f32 %v169_v13, 0.0 }
 0x1dc   :  { %v176_v19 = vmax.f32 %v172_v16, 0.0 }
 0x1de   :  { %v177_v20 = vpack.c.bf16 %v176_v19, %v175_v18 }
 0x1e0   :  { %462 = vmatpush3.bf16.msra.mxu0 %v177_v20 }
 0x1e1   :  { %475 = vmatprep.subr.bf16.mxu0 %v580_v0 }
 0x1e3   :  { %464 = vmatmul.mubr.msk.bf16.vlgmr.msra.gmra.mrb[4].mxu0 %vm74_vm1, %v499_v2 }
 0x1e4   :  { %477 = vmatprep.mubr.msk.bf16.mxu0 %vm581_vm0, %v580_v0 }
 0x2b6   :  { %v217_v22 = vpop.f32.mrb[4].mxu0 }
 0x2b7   :  { %v465_v23 = vpop.f32.mrb[5].mxu0 }
 0x2b8   :  { %v220_v24 = vpop.f32.mrb[6].mxu0 }
 0x2b9   :  { %v224_v25 = vpack.c.bf16 %v220_v24, %v217_v22  ;;  %v466_v26 = vpop.f32.mrb[7].mxu0 }
 0x2bb   :  { %472 = vmatmul.mubr.msk.bf16.vlgmr.msra.gmra.mrb[4].mxu1 %vm243_vm4, %v224_v25 }
 0x2bc   :  { %485 = vmatprep.mubr.msk.bf16.mxu1 %vm581_vm0, %v580_v0  ;;  %482 = vmatpush3.bf16.msra.mxu1 %v502_v27 }
 0x2bd   :  { %483 = vmatprep.subr.bf16.mxu1 %v580_v0 }
 0x2c0   :  { %484 = vmatpush3.bf16.msra.mxu1 %v503_v38 }
 0x38e   :  { %v281_v29 = vpop.f32.mrb[4].mxu1 }
 0x38f   :  { %v282_v30 = vadd.f32 %v426_v28, %v281_v29  ;;  %v473_v31 = vpop.f32.mrb[5].mxu1 }
 0x390   :  { %v284_v32 = vpop.f32.mrb[6].mxu1 }
 0x391   :  { %v285_v33 = vadd.f32 %v426_v28, %v284_v32  ;;  %v474_v34 = vpop.f32.mrb[7].mxu1  ;;  %v288_v35 = vmax.f32 %v282_v30, 0.0 }
 0x393   :  { %v289_v36 = vmax.f32 %v285_v33, 0.0 }
 0x395   :  { %v290_v37 = vpack.c.bf16 %v289_v36, %v288_v35 }
 0x397   :  { %476 = vmatpush3.bf16.msra.mxu0 %v290_v37 }
 0x39a   :  { %478 = vmatmul.mubr.msk.bf16.vlgmr.msra.gmra.mrb[8].mxu0 %vm74_vm1, %v499_v2 }
 0x46d   :  { %v330_v39 = vpop.f32.mrb[8].mxu0 }
 0x46e   :  { %v479_v40 = vpop.f32.mrb[9].mxu0 }
 0x46f   :  { %v333_v41 = vpop.f32.mrb[10].mxu0 }
 0x470   :  { %v337_v42 = vpack.c.bf16 %v333_v41, %v330_v39  ;;  %v480_v43 = vpop.f32.mrb[11].mxu0 }
 0x472   :  { %486 = vmatmul.mubr.msk.bf16.vlgmr.msra.gmra.mrb[8].mxu1 %vm243_vm4, %v337_v42 }
 0x545   :  { %v393_v45 = vpop.f32.mrb[8].mxu1 }
 0x546   :  { %v394_v46 = vadd.f32 %v431_v44, %v393_v45  ;;  %v487_v47 = vpop.f32.mrb[9].mxu1 }
 0x547   :  { %v396_v48 = vpop.f32.mrb[10].mxu1 }
 0x548   :  { %400 = vst [vmem:[#allocation7] sm:$0xff] %v394_v46  ;;  %v397_v49 = vadd.f32 %v431_v44, %v396_v48  ;;  %v488_v50 = vpop.f32.mrb[11].mxu1 }
 0x54a   :  { %401 = vst [vmem:[#allocation7 + $0x8] sm:$0xff] %v397_v49 }
 0x54b   :  { %559 = shalt.err (!%p556_p6)
}
 0x54c   :  { %s560_s22 = scalar_lea.hbm %s709_s8, 256 }
 0x54d   :  { %p561_p7 = scmp.ne.s32.totalorder %s709_s8, %s560_s22  ;;  %p564_p8 = scmp.lt.u32.totalorder %s560_s22, %s709_s8 }
 0x54f   :  { %p566_p9 = pnand %p564_p8, %p561_p7 }
 0x551   :  { %569 = shalt.err (!%p566_p9)
}
 0x552   :  { %s583_s27 = smov 128   ;;  %s584_s29 = smov 8  }
 0x553   :  { %413 = dma.vmem_to_hbm [thread:$0]  %s408_s20, 256, %s709_s8, [#allocation4], %s583_s27, %s583_s27, %s584_s29  }
 0x554   :  { %574 = dma.done.wait [#allocation4], 256  }
 0x555   :  { %575 = vsyncadd [#allocation4], 4294967040 }
 0x556   :  { %417 = vsyncpa [#allocation3], 1 }
 0x557   :  { %418 = vsyncpa [#allocation6], 1 }
 0x558   :  { %419 = vsyncpa [#allocation4], 1 }

</bundles_post_ra>
